<compile_context>
chip_gen: v7x
topology: tpu7x:2x2x1
jax: 0.10.0
libtpu: 0.0.40
codegen_flags: <defaults>
</compile_context>

<pallas_src>
import jax
import jax.numpy as jnp
from jax.experimental import pallas as pl
from jax.experimental.pallas import tpu as pltpu


def _round_up(x, m):
    return (x + m - 1) // m * m


def _pick_row_tile(C, B, max_rows=256):
    """Largest divisor tc of C with B*tc <= max_rows, obeying the TPU block
    rule (tc % 8 == 0 or tc == C).  Falls back to C (always legal)."""
    if B * C <= max_rows:
        return C
    best = C
    for tc in range(1, C + 1):
        if C % tc == 0 and (tc % 8 == 0 or tc == C) and B * tc <= max_rows:
            best = tc
    return best


def _pick_col_tile(bv_pad, target=512):
    """Largest multiple of 128 that divides bv_pad and is <= target."""
    tn = min(bv_pad, max(128, (target // 128) * 128))
    while bv_pad % tn != 0:
        tn -= 128
    return tn


def _vt_kernel(x_ref, w1_ref, b1_ref, w2_ref, b2_ref, o_ref, h_ref):
    # Grid: (view i, row-tile ci, column-tile j).  h depends only on (i, ci),
    # so compute it once per (i, ci) and reuse across the column tiles j.
    j = pl.program_id(2)

    @pl.when(j == 0)
    def _first_layer():
        b, tc, fvd = x_ref.shape
        x = x_ref[...].reshape(b * tc, fvd).astype(jnp.bfloat16)
        h = jnp.dot(x, w1_ref[...], preferred_element_type=jnp.float32)
        h = jnp.maximum(h + b1_ref[...], 0.0)          # bias + ReLU in f32
        h_ref[...] = h.astype(h_ref.dtype)             # keep bf16 for 2nd MXU pass

    y = jnp.dot(h_ref[...], w2_ref[...], preferred_element_type=jnp.float32)
    y = jnp.maximum(y + b2_ref[...], 0.0)
    b, tc, tn = o_ref.shape
    o_ref[...] = y.reshape(b, tc, tn).astype(o_ref.dtype)


def view_transformation(feat, w1, b1, w2, b2, bv_size):
    """feat: (B, N, C, H, W) float32.
    w1: (N, fv_dim, bv_dim), b1: (N, 1, bv_dim)
    w2: (N, bv_dim, bv_dim), b2: (N, 1, bv_dim)
    returns (B, N, C, bv_h, bv_w)."""
    B, N, C, H, W = feat.shape
    fv_dim = H * W
    bv_h, bv_w = bv_size
    bv_dim = bv_h * bv_w
    bv_pad = _round_up(bv_dim, 128)
    pad = bv_pad - bv_dim

    # (B, N, C, H, W) -> (B, N, C, fv_dim): trailing-dim merge only, no HBM
    # transpose pass.  fv_dim stays unpadded (full-extent block dim is legal).
    x = feat.reshape(B, N, C, fv_dim)

    # Zero-pad the bird's-eye feature dim to a lane-dense multiple of 128.
    # Padded weight columns / bias entries are zero => padded outputs are
    # exactly ReLU(0) = 0 and get sliced off below.
    if pad:
        w1 = jnp.pad(w1, ((0, 0), (0, 0), (0, pad)))
        b1 = jnp.pad(b1, ((0, 0), (0, 0), (0, pad)))
        w2 = jnp.pad(w2, ((0, 0), (0, pad), (0, pad)))
        b2 = jnp.pad(b2, ((0, 0), (0, 0), (0, pad)))

    # bf16 MXU inputs, f32 accumulation; biases stay f32.
    w1 = w1.astype(jnp.bfloat16)
    w2 = w2.astype(jnp.bfloat16)
    b1 = b1.astype(jnp.float32)
    b2 = b2.astype(jnp.float32)

    tc = _pick_row_tile(C, B)          # rows per tile = B * tc
    tn = _pick_col_tile(bv_pad)        # second-matmul output-column tile
    rows = B * tc
    grid = (N, C // tc, bv_pad // tn)

    in_specs = [
        # x: (B, N, C, fv_dim) — view axis squeezed, rows tiled over C.
        pl.BlockSpec((B, pl.Squeezed(), tc, fv_dim),
                     lambda i, ci, j: (0, i, ci, 0)),
        # w1: (N, fv_dim, bv_pad) — resident per view.
        pl.BlockSpec((pl.Squeezed(), fv_dim, bv_pad),
                     lambda i, ci, j: (i, 0, 0)),
        # b1: (N, 1, bv_pad)
        pl.BlockSpec((pl.Squeezed(), 1, bv_pad),
                     lambda i, ci, j: (i, 0, 0)),
        # w2: (N, bv_pad, bv_pad) — column-tiled (bounds VMEM on v7x).
        pl.BlockSpec((pl.Squeezed(), bv_pad, tn),
                     lambda i, ci, j: (i, 0, j)),
        # b2: (N, 1, bv_pad) — column-tiled to match.
        pl.BlockSpec((pl.Squeezed(), 1, tn),
                     lambda i, ci, j: (i, 0, j)),
    ]
    out_specs = pl.BlockSpec((B, pl.Squeezed(), tc, tn),
                             lambda i, ci, j: (0, i, ci, j))

    # Explicit VMEM budget: double-buffered I/O blocks + the h scratch.
    blk_bytes = (rows * fv_dim * 4        # x block (f32)
                 + fv_dim * bv_pad * 2    # w1 (bf16)
                 + bv_pad * 4             # b1 (f32)
                 + bv_pad * tn * 2        # w2 tile (bf16)
                 + tn * 4                 # b2 tile (f32)
                 + rows * tn * 4)         # out block (f32)
    vmem_needed = 2 * blk_bytes + rows * bv_pad * 2
    vmem_limit = int(min(max(2 * vmem_needed, 16 << 20), 100 << 20))

    flops = 2 * N * B * C * (fv_dim * bv_pad + bv_pad * bv_pad)
    bytes_accessed = (x.size * 4 + w1.size * 2 + b1.size * 4
                      + w2.size * 2 + b2.size * 4 + B * N * C * bv_pad * 4)
    cost = pl.CostEstimate(flops=flops, transcendentals=0,
                           bytes_accessed=int(bytes_accessed))

    out = pl.pallas_call(
        _vt_kernel,
        out_shape=jax.ShapeDtypeStruct((B, N, C, bv_pad), feat.dtype),
        grid_spec=pltpu.PrefetchScalarGridSpec(
            num_scalar_prefetch=0,
            grid=grid,
            in_specs=in_specs,
            out_specs=out_specs,
            scratch_shapes=[pltpu.VMEM((rows, bv_pad), jnp.bfloat16)],
        ),
        compiler_params=pltpu.CompilerParams(
            dimension_semantics=("parallel", "parallel", "arbitrary"),
            vmem_limit_bytes=vmem_limit,
        ),
        cost_estimate=cost,
    )(x, w1, b1, w2, b2)

    if pad:
        out = out[..., :bv_dim]
    return out.reshape(B, N, C, bv_h, bv_w)


def _reference(feat, w1, b1, w2, b2, bv_size):
    B, N, C, H, W = feat.shape
    x = feat.reshape(B, N, C, H * W)
    outs = []
    for i in range(N):
        h = jnp.maximum(x[:, i] @ w1[i] + b1[i], 0.0)
        y = jnp.maximum(h @ w2[i] + b2[i], 0.0)
        outs.append(y.reshape(B, C, bv_size[0], bv_size[1]))
    return jnp.stack(outs, axis=1)


if __name__ == "__main__":
    # Small shapes consistent with the module.
    B, C = 2, 4
    n_views = 6
    fv_size = (4, 8)          # H, W of the front-view feature
    bv_size = (4, 8)          # bird's-eye-view output spatial size
    fv_dim = fv_size[0] * fv_size[1]
    bv_dim = bv_size[0] * bv_size[1]

    key = jax.random.PRNGKey(0)
    k_feat, k_w1, k_b1, k_w2, k_b2 = jax.random.split(key, 5)

    feat = jax.random.normal(
        k_feat, (B, n_views, C, fv_size[0], fv_size[1]), dtype=jnp.float32)

    # Deterministic synthetic parameters (one Linear pair per view), stored
    # pre-transposed so the kernel computes x @ W + b.
    w1 = jax.random.normal(k_w1, (n_views, fv_dim, bv_dim), jnp.float32) * 0.05
    b1 = jax.random.normal(k_b1, (n_views, 1, bv_dim), jnp.float32) * 0.01
    w2 = jax.random.normal(k_w2, (n_views, bv_dim, bv_dim), jnp.float32) * 0.05
    b2 = jax.random.normal(k_b2, (n_views, 1, bv_dim), jnp.float32) * 0.01

    out = view_transformation(feat, w1, b1, w2, b2, bv_size)
    out = jax.block_until_ready(out)

    ref = _reference(feat, w1, b1, w2, b2, bv_size)
    assert out.shape == (B, n_views, C, bv_size[0], bv_size[1])
    # bf16 MXU inputs with f32 accumulation: loosened tolerance vs f32 reference.
    assert jnp.allclose(out, ref, atol=2e-2, rtol=2e-2), (
        float(jnp.max(jnp.abs(out - ref))))

    print("KERNEL_OK")
</pallas_src>

<mosaic_0001>
module attributes {stable_mosaic.version = 11 : i64} {
  func.func @_vt_kernel(%arg0: i32, %arg1: i32, %arg2: i32, %arg3: memref<2x1x4x32xf32, #tpu.memory_space<vmem>>, %arg4: memref<1x32x128xbf16, #tpu.memory_space<vmem>>, %arg5: memref<1x1x128xf32, #tpu.memory_space<vmem>>, %arg6: memref<1x128x128xbf16, #tpu.memory_space<vmem>>, %arg7: memref<1x1x128xf32, #tpu.memory_space<vmem>>, %arg8: memref<2x1x4x128xf32, #tpu.memory_space<vmem>>, %arg9: memref<8x128xbf16, #tpu.memory_space<vmem>>) attributes {dimension_semantics = [#tpu.dimension_semantics<parallel>, #tpu.dimension_semantics<parallel>, #tpu.dimension_semantics<arbitrary>], iteration_bounds = array<i64: 6, 1, 1>, scalar_prefetch = 0 : i64, scratch_operands = 1 : i64, tpu.core_type = #tpu.core_type<tc>, window_params = [{transform_indices = @transform_0, window_bounds = array<i64: 2, 1, 4, 32>}, {transform_indices = @transform_1, window_bounds = array<i64: 1, 32, 128>}, {transform_indices = @transform_2, window_bounds = array<i64: 1, 1, 128>}, {transform_indices = @transform_3, window_bounds = array<i64: 1, 128, 128>}, {transform_indices = @transform_4, window_bounds = array<i64: 1, 1, 128>}, {transform_indices = @transform_5, window_bounds = array<i64: 2, 1, 4, 128>}]} {
    %c0_i32 = arith.constant 0 : i32
    %0 = arith.cmpi eq, %arg2, %c0_i32 : i32
    %1 = arith.extui %0 : i1 to i32
    %c0_i32_0 = arith.constant 0 : i32
    %2 = arith.cmpi ne, %1, %c0_i32_0 : i32
    scf.if %2 {
      %c0_13 = arith.constant 0 : index
      %c0_14 = arith.constant 0 : index
      %c0_15 = arith.constant 0 : index
      %c0_16 = arith.constant 0 : index
      %17 = vector.load %arg3[%c0_13, %c0_14, %c0_15, %c0_16] : memref<2x1x4x32xf32, #tpu.memory_space<vmem>>, vector<2x1x4x32xf32>
      %18 = vector.shape_cast %17 : vector<2x1x4x32xf32> to vector<2x4x32xf32>
      %19 = vector.shape_cast %18 : vector<2x4x32xf32> to vector<8x32xf32>
      %20 = arith.truncf %19 : vector<8x32xf32> to vector<8x32xbf16>
      %c0_17 = arith.constant 0 : index
      %c0_18 = arith.constant 0 : index
      %c0_19 = arith.constant 0 : index
      %21 = vector.load %arg4[%c0_17, %c0_18, %c0_19] : memref<1x32x128xbf16, #tpu.memory_space<vmem>>, vector<1x32x128xbf16>
      %22 = vector.shape_cast %21 : vector<1x32x128xbf16> to vector<32x128xbf16>
      %cst_20 = arith.constant dense<0.000000e+00> : vector<8x128xf32>
      %23 = tpu.matmul %20, %22, %cst_20 {dimension_numbers = #tpu.dot_dimension_numbers<[1], [0], [0], [1], [0, 0, 1, 1], [], []>} : vector<8x32xbf16>, vector<32x128xbf16>, vector<8x128xf32> -> vector<8x128xf32>
      %c0_21 = arith.constant 0 : index
      %c0_22 = arith.constant 0 : index
      %c0_23 = arith.constant 0 : index
      %24 = vector.load %arg5[%c0_21, %c0_22, %c0_23] : memref<1x1x128xf32, #tpu.memory_space<vmem>>, vector<1x1x128xf32>
      %25 = vector.shape_cast %24 : vector<1x1x128xf32> to vector<1x128xf32>
      %26 = vector.broadcast %25 : vector<1x128xf32> to vector<8x128xf32>
      %27 = arith.addf %23, %26 : vector<8x128xf32>
      %cst_24 = arith.constant 0.000000e+00 : f32
      %28 = vector.broadcast %cst_24 : f32 to vector<8x128xf32>
      %29 = arith.maximumf %27, %28 : vector<8x128xf32>
      %30 = arith.truncf %29 : vector<8x128xf32> to vector<8x128xbf16>
      %c0_25 = arith.constant 0 : index
      %c0_26 = arith.constant 0 : index
      %31 = vector.load %arg9[%c0_25, %c0_26] : memref<8x128xbf16, #tpu.memory_space<vmem>>, vector<8x128xbf16>
      tpu.vector_store %arg9[%c0_25, %c0_26], %30 {strides = array<i32>} : memref<8x128xbf16, #tpu.memory_space<vmem>>, vector<8x128xbf16>,
    } else {
    }
    %c0 = arith.constant 0 : index
    %c0_1 = arith.constant 0 : index
    %3 = vector.load %arg9[%c0, %c0_1] : memref<8x128xbf16, #tpu.memory_space<vmem>>, vector<8x128xbf16>
    %c0_2 = arith.constant 0 : index
    %c0_3 = arith.constant 0 : index
    %c0_4 = arith.constant 0 : index
    %4 = vector.load %arg6[%c0_2, %c0_3, %c0_4] : memref<1x128x128xbf16, #tpu.memory_space<vmem>>, vector<1x128x128xbf16>
    %5 = vector.shape_cast %4 : vector<1x128x128xbf16> to vector<128x128xbf16>
    %cst = arith.constant dense<0.000000e+00> : vector<8x128xf32>
    %6 = tpu.matmul %3, %5, %cst {dimension_numbers = #tpu.dot_dimension_numbers<[1], [0], [0], [1], [0, 0, 1, 1], [], []>} : vector<8x128xbf16>, vector<128x128xbf16>, vector<8x128xf32> -> vector<8x128xf32>
    %c0_5 = arith.constant 0 : index
    %c0_6 = arith.constant 0 : index
    %c0_7 = arith.constant 0 : index
    %7 = vector.load %arg7[%c0_5, %c0_6, %c0_7] : memref<1x1x128xf32, #tpu.memory_space<vmem>>, vector<1x1x128xf32>
    %8 = vector.shape_cast %7 : vector<1x1x128xf32> to vector<1x128xf32>
    %9 = vector.broadcast %8 : vector<1x128xf32> to vector<8x128xf32>
    %10 = arith.addf %6, %9 : vector<8x128xf32>
    %cst_8 = arith.constant 0.000000e+00 : f32
    %11 = vector.broadcast %cst_8 : f32 to vector<8x128xf32>
    %12 = arith.maximumf %10, %11 : vector<8x128xf32>
    %13 = vector.shape_cast %12 : vector<8x128xf32> to vector<2x4x128xf32>
    %c0_9 = arith.constant 0 : index
    %c0_10 = arith.constant 0 : index
    %c0_11 = arith.constant 0 : index
    %c0_12 = arith.constant 0 : index
    %14 = vector.load %arg8[%c0_9, %c0_10, %c0_11, %c0_12] : memref<2x1x4x128xf32, #tpu.memory_space<vmem>>, vector<2x1x4x128xf32>
    %15 = vector.shape_cast %14 : vector<2x1x4x128xf32> to vector<2x4x128xf32>
    %16 = vector.shape_cast %13 : vector<2x4x128xf32> to vector<2x1x4x128xf32>
    tpu.vector_store %arg8[%c0_9, %c0_10, %c0_11, %c0_12], %16 {strides = array<i32>} : memref<2x1x4x128xf32, #tpu.memory_space<vmem>>, vector<2x1x4x128xf32>,
    return
  }
  func.func @transform_0(%arg0: i32, %arg1: i32, %arg2: i32) -> (i32, i32, i32, i32) {
    %c0_i32 = arith.constant 0 : i32
    %c0_i32_0 = arith.constant 0 : i32
    %c0_i32_1 = arith.constant 0 : i32
    return %c0_i32, %arg0, %arg1, %c0_i32_0 : i32, i32, i32, i32
  }
  func.func @transform_1(%arg0: i32, %arg1: i32, %arg2: i32) -> (i32, i32, i32) {
    %c0_i32 = arith.constant 0 : i32
    %c0_i32_0 = arith.constant 0 : i32
    %c0_i32_1 = arith.constant 0 : i32
    return %arg0, %c0_i32, %c0_i32_0 : i32, i32, i32
  }
  func.func @transform_2(%arg0: i32, %arg1: i32, %arg2: i32) -> (i32, i32, i32) {
    %c0_i32 = arith.constant 0 : i32
    %c0_i32_0 = arith.constant 0 : i32
    %c0_i32_1 = arith.constant 0 : i32
    return %arg0, %c0_i32, %c0_i32_0 : i32, i32, i32
  }
  func.func @transform_3(%arg0: i32, %arg1: i32, %arg2: i32) -> (i32, i32, i32) {
    %c0_i32 = arith.constant 0 : i32
    %c0_i32_0 = arith.constant 0 : i32
    return %arg0, %c0_i32, %arg2 : i32, i32, i32
  }
  func.func @transform_4(%arg0: i32, %arg1: i32, %arg2: i32) -> (i32, i32, i32) {
    %c0_i32 = arith.constant 0 : i32
    %c0_i32_0 = arith.constant 0 : i32
    return %arg0, %c0_i32, %arg2 : i32, i32, i32
  }
  func.func @transform_5(%arg0: i32, %arg1: i32, %arg2: i32) -> (i32, i32, i32, i32) {
    %c0_i32 = arith.constant 0 : i32
    %c0_i32_0 = arith.constant 0 : i32
    return %c0_i32, %arg0, %arg1, %arg2 : i32, i32, i32, i32
  }
}

</mosaic_0001>

<bundles_post_ra>
// kernel: tpu_custom_call.1
= control target key start
LH: loop header
LB: loop body
LE: loop exit
PB: predicated region body
PF: predicated region fallthrough
CT: control target
= control target key end

     0   :  { %s1416_s0 = inlined_call_operand.hbm [shape: f32[2,6,4,32], index: 0, kind: input, shape index: {}]   ;;  %s1417_s1 = inlined_call_operand.hbm [shape: bf16[6,32,128], index: 1, kind: input, shape index: {}]   ;;  %s1418_s2 = inlined_call_operand.vmem [shape: f32[6,1,128], index: 2, kind: input, shape index: {}]   ;;  %s1419_s3 = inlined_call_operand.hbm [shape: bf16[6,128,128], index: 3, kind: input, shape index: {}]   ;;  %s1420_s4 = inlined_call_operand.vmem [shape: f32[6,1,128], index: 4, kind: input, shape index: {}]   ;;  %s1421_s5 = inlined_call_operand.hbm [shape: f32[2,6,4,128], index: 5, kind: output, shape index: {}]  }
   0x1   :  { %1431 = sst [smem:[#allocation17_spill]] %s1416_s0 }
   0x2   :  { %1432 = sst [smem:[#allocation18_spill]] %s1417_s1 }
   0x3   :  { %10 = vsyncpa [#allocation4], 0 }
   0x4   :  { %12 = vsyncpa [#allocation4 + $0x1], 0 }
   0x5   :  { %13 = vsyncpa [#allocation7], 0 }
   0x6   :  { %15 = vsyncpa [#allocation7 + $0x1], 0 }
   0x7   :  { %16 = vsyncpa [#allocation5], 0 }
   0x8   :  { %18 = vsyncpa [#allocation5 + $0x1], 0  ;;  %s1142_s18 = smov 0   ;;  %s1144_s19 = smov 0  }
   0x9   :  { %s1146_s20 = smov 0   ;;  %s1148_s21 = smov 0  }
   0xa   :  { %s1150_s22 = smov 0   ;;  %s1152_s23 = smov 0  }
   0xb LB: > { %1433 = sst [smem:[#allocation13_spill]] %s1086_s20  ;;  %s1173_s24 = sadd.s32 4294967295, %s1098_s23   ;;  %s1098_s23 = sphi %s1152_s23, %s24_s23   ;;  %s1094_s22 = sphi %s1150_s22, %s1458_s22   ;;  %s1090_s21 = sphi %s1148_s21, %s1457_s21   ;;  %s1086_s20 = sphi %s1146_s20, %s1453_s20   ;;  %s1082_s19 = sphi %s1144_s19, %s1456_s19   ;;  %s1078_s18 = sphi %s1142_s18, %s1455_s18  }
   0xc   : > { %s756_s25 = sadd.s32 4294967294, %s1098_s23   ;;  %s43_s26 = sadd.s32 1, %s1094_s22 }
   0xd   : > { %s52_s27 = sadd.s32 1, %s1086_s20  ;;  %p45_p0 = scmp.ge.s32.totalorder %s43_s26, 6 }
   0xe   : > { %p59_p1 = scmp.ne.s32.totalorder %s1086_s20, %s1082_s19  ;;  %p60_p2 = scmp.eq.s32.totalorder %s1098_s23, 0 }
   0xf   : > { %p65_p3 = scmp.ne.s32.totalorder %s1082_s19, %s1078_s18  ;;  %s1460_s26 = smov (%p45_p0, %s43_s26), 0 }
  0x10   : > { %1434 = sst [smem:[#allocation14_spill]] %s1460_s26  ;;  %p61_p4 = por %p60_p2, %p59_p1 }
  0x11   : > { %p66_p5 = scmp.eq.s32.totalorder %s1173_s24, 0  ;;  %s47_s28 = ssub.s32 %s1094_s22, %s1460_s26 }
  0x12   : > { %p201_p6 = scmp.eq.s32.totalorder %s1173_s24, 5  ;;  %p50_p7 = scmp.eq.s32.totalorder %s47_s28, 0 }
  0x13   : > { %p1189_p8 = por %p66_p5, %p65_p3  ;;  %p207_p10 = scmp.eq.s32.totalorder %s756_s25, 5 }
  0x14   : > { %p1193_p9 = por %p201_p6, %p59_p1  ;;  %p853_p12 = scmp.lt.s32.totalorder %s1098_s23, 6 }
  0x15   : > { %s1435_s29 = scalar_select %p1189_p8, 1, 0 }
  0x16   : > { %s1436_s30 = scalar_select %p1193_p9, 1, 0 }
  0x17   : > { %s1198_s6 = scalar_select %p50_p7, %s1086_s20, %s52_s27  }
  0x18   : > { %p1200_p11 = por %p207_p10, %p65_p3  ;;  %s1206_s8 = sand.u32 1, %s1086_s20  }
  0x19   : > { %1437 = sst [smem:[#allocation15_spill]] %s1198_s6  ;;  %p1208_p13 = pnand %p853_p12, %p61_p4 }
  0x1a   : > { %s1438_s7 = scalar_select %p1200_p11, 1, 0 }
  0x1b   : > { %s248_s10 = sand.u32 1, %s1098_s23   ;;  %s761_s11 = sshll.u32 %s1206_s8, 4 }
  0x1c   : > { %1439 = sst [smem:[#allocation16_spill]] %s1438_s7  ;;  %s789_s12 = sshll.u32 %s1094_s22, 8 }
  0x1d   : > { %s252_s13 = scalar_lea.vmem [#allocation6], %s761_s11  ;;  %s1441_s1 = sld [smem:[#allocation18_spill]] }
  0x1e   : > { %s259_s14 = sshll.u32 %s252_s13, 4  ;;  %s1222_s25 = scalar_lea.sflag [#allocation7], %s248_s10  ;;  %s1220_s14 = int_to_ptr.vmem [resolvable:$true] %s259_s14 }
  0x1f   : > { %p1228_p1 = pneg %p1208_p13 }
  0x23   : > { %s1218_s17 = scalar_lea.hbm %s1441_s1, %s789_s12  ;;  %s927_s13 = scalar_lea.hbm %s1441_s1, 1536 }
  0x24   : > { %s922_s27 = scalar_lea.hbm %s1218_s17, 256  ;;  %p928_p4 = scmp.lt.u32.totalorder %s1218_s17, %s1441_s1 }
  0x25   : > { %p923_p0 = scmp.ne.s32.totalorder %s1218_s17, %s922_s27  ;;  %p929_p5 = scmp.lt.u32.totalorder %s927_s13, %s922_s27 }
  0x26   : > { %p931_p7 = scmp.lt.u32.totalorder %s922_s27, %s1218_s17 }
  0x27   : > { %p925_p2 = pnand %p1228_p1, %p923_p0  ;;  %p930_p6 = por %p929_p5, %p928_p4 }
  0x29   : > { %p926_p3 = pneg %p925_p2  ;;  %p932_p10 = por %p931_p7, %p930_p6 }
  0x2b   : > { %p933_p12 = pnand %p932_p10, %p926_p3 }
  0x2d   : > { %936 = shalt.err (!%p933_p12)
}
  0x2e   : > { %s937_s10 = scalar_lea.vmem %s1220_s14, 256  ;;  %s1100_s11 = smov [#allocation6]  }
  0x2f   : > { %p938_p0 = scmp.ne.s32.totalorder %s1220_s14, %s937_s10  ;;  %s942_s12 = sshll.u32 %s1100_s11, 4  ;;  %s943_s12 = int_to_ptr.vmem [resolvable:$false] %s942_s12 }
  0x30   : > { %s944_s15 = scalar_lea.vmem %s943_s12, 512  ;;  %p945_p9 = scmp.lt.s32.totalorder %s1220_s14, %s943_s12 }
  0x31   : > { %p940_p2 = pnand %p938_p0, %p1228_p1  ;;  %p946_p8 = scmp.lt.s32.totalorder %s944_s15, %s937_s10 }
  0x33   : > { %p941_p11 = pneg %p940_p2  ;;  %p947_p4 = por %p946_p8, %p945_p9 }
  0x35   : > { %p948_p5 = pnand %p947_p4, %p941_p11 }
  0x37   : > { %951 = shalt.err (!%p948_p5)
}
  0x38   : > { %s1425_s27 = smov 64   ;;  %s1427_s13 = smov 4  }
  0x39   : > { %845 = dma.hbm_to_vmem [thread:$0]  (!%p1208_p13), %s1218_s17, 256, %s1220_s14, %s1222_s25, %s1425_s27, %s1425_s27, %s1427_s13  }
  0x3a   : > { %p767_p8 = scmp.ge.s32.totalorder %s1098_s23, 1  ;;  %p304_p9 = scmp.lt.s32.totalorder %s1098_s23, 7 }
  0x3b   : > { %s759_s10 = sshll.u32 %s1206_s8, 3  ;;  %s760_s11 = sshll.u32 %s1094_s22, 6 }
  0x3c   : > { %p1257_p11 = pnand %p767_p8, %p304_p9  ;;  %s1444_s0 = sld [smem:[#allocation17_spill]] }
  0x3d   : > { %s231_s26 = scalar_lea.vmem [#allocation3], %s759_s10  ;;  %s764_s14 = sshll.u32 %s1206_s8, 6 }
  0x3e   : > { %s1443_s16 = scalar_select %p1257_p11, 1, 0 }
  0x3f   : > { %s238_s6 = sshll.u32 %s231_s26, 4  ;;  %s228_s17 = scalar_lea.sflag [#allocation4], %s1206_s8  ;;  %s1268_s6 = int_to_ptr.vmem [resolvable:$true] %s238_s6 }
  0x42   : > { %s1266_s1 = scalar_lea.hbm %s1444_s0, %s760_s11  ;;  %s957_s11 = scalar_lea.hbm %s1444_s0, 768 }
  0x43   : > { %s952_s27 = scalar_lea.hbm %s1266_s1, 128  ;;  %p958_p10 = scmp.lt.u32.totalorder %s1266_s1, %s1444_s0 }
  0x44   : > { %p953_p3 = scmp.ne.s32.totalorder %s1266_s1, %s952_s27  ;;  %p959_p12 = scmp.lt.u32.totalorder %s957_s11, %s952_s27 }
  0x45   : > { %p961_p2 = scmp.lt.u32.totalorder %s952_s27, %s1266_s1 }
  0x46   : > { %p955_p6 = pnand %p953_p3, %p1228_p1  ;;  %p960_p0 = por %p959_p12, %p958_p10 }
  0x48   : > { %p956_p7 = pneg %p955_p6  ;;  %p962_p4 = por %p961_p2, %p960_p0 }
  0x4a   : > { %p963_p5 = pnand %p962_p4, %p956_p7 }
  0x4c   : > { %966 = shalt.err (!%p963_p5)
}
  0x4d   : > { %s967_s26 = scalar_lea.vmem %s1268_s6, 128  ;;  %s1103_s20 = smov [#allocation3]  }
  0x4e   : > { %p968_p8 = scmp.ne.s32.totalorder %s1268_s6, %s967_s26  ;;  %s972_s13 = sshll.u32 %s1103_s20, 4  ;;  %s973_s13 = int_to_ptr.vmem [resolvable:$false] %s972_s13 }
  0x4f   : > { %s974_s10 = scalar_lea.vmem %s973_s13, 256  ;;  %p975_p6 = scmp.lt.s32.totalorder %s1268_s6, %s973_s13 }
  0x50   : > { %p970_p9 = pnand %p968_p8, %p1228_p1  ;;  %p976_p11 = scmp.lt.s32.totalorder %s974_s10, %s967_s26 }
  0x52   : > { %p971_p3 = pneg %p970_p9  ;;  %p977_p10 = por %p976_p11, %p975_p6 }
  0x54   : > { %p978_p12 = pnand %p977_p10, %p971_p3 }
  0x56   : > { %981 = shalt.err (!%p978_p12)
}
  0x57   : > { %s1104_s27 = smov 384   ;;  %s1445_s11 = smov 4  }
  0x58   : > { %s1446_s12 = smov 64   ;;  %s790_s15 = sshll.u32 %s1094_s22, 10 }
  0x59   : > { %842 = dma.hbm_to_vmem [thread:$0]  (!%p1208_p13), %s1266_s1, 128, %s1268_s6, %s228_s17, %s1104_s27, %s1446_s12, %s1445_s11  }
  0x5a   : > { %s1301_s26 = scalar_lea.hbm %s1419_s3, %s790_s15  ;;  %s279_s10 = scalar_lea.vmem [#allocation8], %s764_s14 }
  0x5b   : > { %s287_s0 = sshll.u32 %s279_s10, 4  ;;  %s982_s7 = scalar_lea.hbm %s1301_s26, 1024  ;;  %s1305_s0 = int_to_ptr.vmem [resolvable:$true] %s287_s0 }
  0x5c   : > { %p983_p11 = scmp.ne.s32.totalorder %s1301_s26, %s982_s7  ;;  %s987_s17 = scalar_lea.hbm %s1419_s3, 6144 }
  0x5d   : > { %p988_p2 = scmp.lt.u32.totalorder %s1301_s26, %s1419_s3  ;;  %p989_p4 = scmp.lt.u32.totalorder %s987_s17, %s982_s7 }
  0x5e   : > { %p985_p7 = pnand %p983_p11, %p1228_p1  ;;  %p991_p8 = scmp.lt.u32.totalorder %s982_s7, %s1301_s26 }
  0x5f   : > { %p990_p5 = por %p989_p4, %p988_p2 }
  0x60   : > { %p986_p0 = pneg %p985_p7 }
  0x61   : > { %p992_p9 = por %p991_p8, %p990_p5 }
  0x63   : > { %p993_p3 = pnand %p992_p9, %p986_p0 }
  0x65   : > { %996 = shalt.err (!%p993_p3)
}
  0x66   : > { %s997_s8 = scalar_lea.vmem %s1305_s0, 1024  ;;  %s1105_s14 = smov [#allocation8]  }
  0x67   : > { %p998_p6 = scmp.ne.s32.totalorder %s1305_s0, %s997_s8  ;;  %s1002_s20 = sshll.u32 %s1105_s14, 4  ;;  %s1003_s20 = int_to_ptr.vmem [resolvable:$false] %s1002_s20 }
  0x68   : > { %s1004_s13 = scalar_lea.vmem %s1003_s20, 2048  ;;  %p1005_p11 = scmp.lt.s32.totalorder %s1305_s0, %s1003_s20 }
  0x69   : > { %p1000_p10 = pnand %p998_p6, %p1228_p1  ;;  %p1006_p7 = scmp.lt.s32.totalorder %s1004_s13, %s997_s8 }
  0x6b   : > { %p1001_p12 = pneg %p1000_p10  ;;  %p1007_p2 = por %p1006_p7, %p1005_p11 }
  0x6d   : > { %p1008_p4 = pnand %p1007_p2, %p1001_p12 }
  0x6f   : > { %1011 = shalt.err (!%p1008_p4)
}
  0x70   : > { %848 = dma.hbm_to_vmem [thread:$0]  (!%p1208_p13), %s1301_s26, 1024, %s1305_s0, %s1222_s25, %s1446_s12, %s1446_s12, %s1445_s11  }
  0x71   : > { %p1447_p1 = scmp.ne.s32.totalorder %s1443_s16, 0 }
  0x72   : > { %s1335_s7 = sand.u32 (!%p1447_p1), 1, %s1082_s19   ;;  %p1448_p0 = scmp.ne.s32.totalorder (!%p1447_p1), %s1435_s29, 0 }
  0x73   : > { %308 = sbr.rel (%p1447_p1) target bundleno = 596 (0x254), region = 40  ;;  %s768_s28 = sshll.u32 (!%p1447_p1), %s1335_s7, 3 }
  0x74   : > { %s311_s10 = scalar_lea.sflag (!%p1447_p1), [#allocation4], %s1335_s7  ;;  %s314_s9 = scalar_lea.vmem (!%p1447_p1), [#allocation3], %s768_s28 }
  0x7a   : > { %1065 = dma.done.wait (%p1448_p0), %s311_s10, 128  }
  0x7b   : > { %1067 = vsyncadd (%p1448_p0), %s311_s10, 4294967168  ;;  %s319_s0 = sand.u32 1, %s1173_s24   ;;  %s769_s25 = sshll.u32 %s1335_s7, 4 }
  0x7c   : > { %s320_s16 = scalar_lea.sflag [#allocation7], %s319_s0  ;;  %s323_s11 = scalar_lea.vmem [#allocation6], %s769_s25 }
  0x7d   : > { %1069 = dma.done.wait (%p1448_p0), %s320_s16, 1280  }
  0x7e   : > { %1071 = vsyncadd (%p1448_p0), %s320_s16, 4294966016  ;;  %v1106_v0 = vmov 0.0   ;;  %vm1107_vm0 = vmmov 0   ;;  %s770_s12 = sshll.u32 %s1335_s7, 6  ;;  %v911_v1 = vld [vmem:[%s323_s11] sm:$0xff]   ;;  %v912_v2 = vld [vmem:[%s323_s11 + $0x8] sm:$0xff]  }
  0x7f   : > { %803 = vmatprep.subr.bf16.mxu0 %v1106_v0  ;;  %807 = vmatprep.mubr.msk.bf16.mxu0 %vm1107_vm0, %v1106_v0  ;;  %v913_v3 = vld [vmem:[%s314_s9] sm:$0xff]   ;;  %s332_s24 = scalar_lea.vmem [#allocation8], %s770_s12  ;;  %vm422_vm1 = vcmask 261120   ;;  %p378_p13 = scmp.lt.s32.totalorder %s1090_s21, 5 }
  0x80   : > { %811 = vmatprep.subr.bf16.mxu1 %v1106_v0  ;;  %827 = vmatprep.mubr.msk.bf16.mxu1 %vm1107_vm0, %v1106_v0  ;;  %v914_v4 = vld [vmem:[%s332_s24] sm:$0xff]   ;;  %v398_v5 = vpack.c.bf16 %v913_v3, %v913_v3  ;;  %v915_v6 = vld [vmem:[%s332_s24 + $0x8] sm:$0xff]   ;;  %v916_v7 = vld [vmem:[%s332_s24 + $0x10] sm:$0xff]   ;;  %s377_s8 = scalar_lea.vmem [#allocation9], %s768_s28  ;;  %s786_s20 = sshll.u32 %s1090_s21, 6 }
  0x81   : > { %804 = vmatpush3.bf16.msra.mxu0 %v911_v1  ;;  %812 = vmatpush3.bf16.msra.mxu1 %v914_v4  ;;  %v917_v8 = vld [vmem:[%s332_s24 + $0x18] sm:$0xff]   ;;  %v918_v9 = vld [vmem:[%s332_s24 + $0x20] sm:$0xff]   ;;  %v919_v10 = vld [vmem:[%s332_s24 + $0x28] sm:$0xff]   ;;  %s379_s29 = scalar_select %p378_p13, %s1090_s21, 5 }
  0x82   : > { %805 = vmatprep.subr.bf16.mxu0 %v1106_v0  ;;  %813 = vmatprep.subr.bf16.mxu1 %v1106_v0  ;;  %v920_v11 = vld [vmem:[%s332_s24 + $0x30] sm:$0xff]   ;;  %v921_v12 = vld [vmem:[%s332_s24 + $0x38] sm:$0xff]   ;;  %s602_s14 = sshll.u32 %s377_s8, 4  ;;  %s1368_s9 = scalar_lea.hbm %s1421_s5, %s786_s20  ;;  %s1363_s14 = int_to_ptr.vmem [resolvable:$true] %s602_s14 }
  0x83   : > { %s380_s6 = scalar_lea.vmem %s1418_s2, %s379_s29  ;;  %s386_s15 = scalar_lea.vmem %s1420_s4, %s379_s29 }
  0x84   : > { %v772_v13 = vld [vmem:[%s380_s6] ss:$0 sm:$0xff]  ;;  %s588_s28 = scalar_lea.sflag [#allocation5], %s1335_s7  ;;  %s1012_s0 = scalar_lea.vmem %s1363_s14, 128 }
  0x85   : > { %806 = vmatpush3.bf16.msra.mxu0 %v912_v2  ;;  %814 = vmatpush3.bf16.msra.mxu1 %v915_v6  ;;  %v776_v22 = vld [vmem:[%s386_s15] ss:$0 sm:$0xff]  ;;  %p1013_p5 = scmp.ne.s32.totalorder %s1363_s14, %s1012_s0  ;;  %p1449_p8 = scmp.ne.s32.totalorder %s1436_s30, 0 }
  0x86   : > { %815 = vmatprep.subr.bf16.mxu1 %v1106_v0  ;;  %s1108_s21 = smov [#allocation9]  }
  0x87   : > { %p1014_p9 = pnand %p1013_p5, %p1449_p8  ;;  %s1016_s25 = sshll.u32 %s1108_s21, 4  ;;  %s1017_s25 = int_to_ptr.vmem [resolvable:$false] %s1016_s25 }
  0x88   : > { %808 = vmatmul.mubr.msk.bf16.vlgmr.msra.gmra.mrb[0].mxu0 %vm422_vm1, %v398_v5  ;;  %s1018_s16 = scalar_lea.vmem %s1017_s25, 256  ;;  %p1019_p6 = scmp.lt.s32.totalorder %s1363_s14, %s1017_s25 }
  0x89   : > { %816 = vmatpush3.bf16.msra.mxu1 %v916_v7  ;;  %p1015_p3 = pneg %p1014_p9  ;;  %p1020_p10 = scmp.lt.s32.totalorder %s1018_s16, %s1012_s0 }
  0x8a   : > { %817 = vmatprep.subr.bf16.mxu1 %v1106_v0 }
  0x8b   : > { %p1021_p12 = por %p1020_p10, %p1019_p6 }
  0x8d   : > { %818 = vmatpush3.bf16.msra.mxu1 %v917_v8  ;;  %p1022_p11 = pnand %p1021_p12, %p1015_p3 }
  0x8e   : > { %819 = vmatprep.subr.bf16.mxu1 %v1106_v0 }
  0x91   : > { %820 = vmatpush3.bf16.msra.mxu1 %v918_v9 }
  0x92   : > { %821 = vmatprep.subr.bf16.mxu1 %v1106_v0 }
  0x95   : > { %822 = vmatpush3.bf16.msra.mxu1 %v919_v10 }
  0x96   : > { %823 = vmatprep.subr.bf16.mxu1 %v1106_v0 }
  0x99   : > { %824 = vmatpush3.bf16.msra.mxu1 %v920_v11 }
  0x9a   : > { %825 = vmatprep.subr.bf16.mxu1 %v1106_v0 }
  0x9d   : > { %826 = vmatpush3.bf16.msra.mxu1 %v921_v12 }
 0x15b   : > { %v460_v14 = vpop.f32.mrb[0].mxu0 }
 0x15c   : > { %v461_v15 = vadd.f32 %v772_v13, %v460_v14  ;;  %v809_v16 = vpop.f32.mrb[1].mxu0 }
 0x15d   : > { %v463_v17 = vpop.f32.mrb[2].mxu0 }
 0x15e   : > { %v466_v18 = vmax.f32 %v461_v15, 0.0  ;;  %v810_v19 = vpop.f32.mrb[3].mxu0 }
 0x160   : > { %v467_v20 = vpack.c.bf16 %v466_v18, %v466_v18 }
 0x162   : > { %468 = vst [vmem:[#allocation2] sm:$0xf] %v467_v20 }
 0x169   : > { %v469_v21 = vld [vmem:[#allocation2] sm:$0xf] }
 0x16a   : > { %828 = vmatmul.mubr.bf16.vlgmr.msra.gmra.mrb[0].mxu1 %v469_v21 }
 0x23d   : > { %v575_v23 = vpop.f32.mrb[0].mxu1 }
 0x23e   : > { %v576_v24 = vadd.f32 %v776_v22, %v575_v23  ;;  %v829_v25 = vpop.f32.mrb[1].mxu1 }
 0x23f   : > { %v578_v26 = vpop.f32.mrb[2].mxu1 }
 0x240   : > { %v581_v27 = vmax.f32 %v576_v24, 0.0  ;;  %v830_v28 = vpop.f32.mrb[3].mxu1 }
 0x242   : > { %v583_v29 = vcombine.high %v581_v27, %v581_v27  ;;  %585 = vst [vmem:[%s377_s8] sm:$0xf] %v581_v27 }
 0x244   : > { %586 = vst [vmem:[%s377_s8 + $0x4] sm:$0xf] %v583_v29 }
 0x245   : > { %1025 = shalt.err (!%p1022_p11)
}
 0x246   : > { %s1026_s11 = scalar_lea.hbm %s1368_s9, 128  ;;  %s1030_s29 = scalar_lea.hbm %s1421_s5, 768 }
 0x247   : > { %p1027_p7 = scmp.ne.s32.totalorder %s1368_s9, %s1026_s11  ;;  %p1031_p1 = scmp.lt.u32.totalorder %s1368_s9, %s1421_s5 }
 0x248   : > { %p1032_p0 = scmp.lt.u32.totalorder %s1030_s29, %s1026_s11  ;;  %p1034_p5 = scmp.lt.u32.totalorder %s1026_s11, %s1368_s9 }
 0x249   : > { %p1028_p2 = pnand %p1027_p7, %p1449_p8 }
 0x24a   : > { %p1033_p13 = por %p1032_p0, %p1031_p1 }
 0x24b   : > { %p1029_p4 = pneg %p1028_p2 }
 0x24c   : > { %p1035_p9 = por %p1034_p5, %p1033_p13 }
 0x24e   : > { %p1036_p3 = pnand %p1035_p9, %p1029_p4 }
 0x250   : > { %1039 = shalt.err (!%p1036_p3)
}
 0x251   : > { %s1109_s6 = smov 64   ;;  %s1110_s17 = smov 384  }
 0x252   : > { %s1111_s27 = smov 4  }
 0x253   : > { %837 = dma.vmem_to_hbm [thread:$0]  (%p1449_p8), %s1363_s14, 128, %s1368_s9, %s588_s28, %s1109_s6, %s1110_s17, %s1111_s27  }
 0x254 PF: > { %s1450_s15 = sld [smem:[#allocation16_spill]]  ;;  %p854_p6 = scmp.ge.s32.totalorder %s1098_s23, 2 }
 0x255   : > { %s617_s8 = sand.u32 1, %s1078_s18  }
 0x256   : > { %s618_s20 = scalar_lea.sflag [#allocation5], %s617_s8 }
 0x25a   : > { %p1451_p10 = scmp.ne.s32.totalorder %s1450_s15, 0 }
 0x25c   : > { %p850_p12 = pnand %p854_p6, %p1451_p10 }
 0x25e   : > { %1073 = dma.done.wait (!%p850_p12), %s618_s20, 128  }
 0x25f   : > { %1075 = vsyncadd (!%p850_p12), %s618_s20, 4294967168  ;;  %s24_s23 = sadd.s32 1, %s1098_s23   ;;  %s1452_s13 = sld [smem:[#allocation13_spill]] }
 0x260   : > { %p21_p11 = scmp.ge.s32.totalorder %s24_s23, 8   ;;  %s1453_s20 = sld [smem:[#allocation15_spill]] }
 0x261   : > { %s1454_s30 = sld [smem:[#allocation14_spill]]  ;;  %s1455_s18 = smov %s1082_s19 }
 0x262   : > { %s1457_s21 = smov %s1094_s22  ;;  %23 = sbr.rel (!%p21_p11) target bundleno = 11 (0xb), region = 119 }
 0x265   : > { %s1456_s19 = smov %s1452_s13 }
 0x267   : > { %s1458_s22 = smov %s1454_s30 }
 0x269   :  { %623 = vsyncpa [#allocation4], 1 }
 0x26a   :  { %625 = vsyncpa [#allocation4 + $0x1], 1 }
 0x26b   :  { %626 = vsyncpa [#allocation7], 1 }
 0x26c   :  { %628 = vsyncpa [#allocation7 + $0x1], 1 }
 0x26d   :  { %629 = vsyncpa [#allocation5], 1 }
 0x26e   :  { %631 = vsyncpa [#allocation5 + $0x1], 1 }

</bundles_post_ra>
